<compile_context>
chip_gen: v6e
topology: v6e:2x2x1
jax: 0.10.0
libtpu: 0.0.40
codegen_flags: <defaults>
</compile_context>

<pallas_src>
import functools
import math

import jax
import jax.numpy as jnp
import numpy as np
from jax.experimental import pallas as pl
from jax.experimental.pallas import tpu as pltpu


def _fused_basic_block_kernel(tapsc_ref, wc_ref, biasc_ref, mask2_ref, w2_ref, bias2_ref,
                              out_ref, *, planes, kh2, kw2, wo, n_cols):
    """Whole BasicBlock in one program, transposed layout (channels x positions).

    tapsc_ref : (KK*Cin + Cin, NP)    im2col of x for conv1 + the 1x1-downsample taps
    wc_ref    : (2*planes, KK*Cin+Cin) [scaled conv1 | scaled conv_ds] weights, fused out-channels
    biasc_ref : (2*planes, 1)          [bn1 bias | bn_ds bias]
    mask2_ref : (KK2*planes, NP)       0/1 spatial boundary mask for conv2's shifted taps
    w2_ref    : (planes, KK2*planes)   scaled conv2 weights
    bias2_ref : (planes, 1)            bn2 bias
    out_ref   : (planes, NP)           lane-dense output slab
    """
    # conv1 + downsample: one MXU push (fused contraction, fused output channels) + bias
    pre = jnp.dot(wc_ref[...], tapsc_ref[...], preferred_element_type=jnp.float32)
    pre = pre + biasc_ref[...]
    h_t = jnp.maximum(pre[:planes, :], 0.0)        # relu(bn1(mask*conv1(x)))   (planes, NP)
    res_t = pre[planes:2 * planes, :]              # bn_ds(mask*conv_ds(x))     (planes, NP)

    # conv2's im2col of h: 9 static lane rotations (XLU) instead of a dense gather matmul.
    # Each rolled copy is a whole (8,128) vreg, so the sublane concat is a cheap stack; the
    # wrap-around / out-of-image lanes are zeroed by the precomputed boundary mask.
    shifted = []
    for t in range(kh2 * kw2):
        a, b = t // kw2, t % kw2
        d = (a - kh2 // 2) * wo + (b - kw2 // 2)   # flat lane offset of tap (a, b)
        sh = pltpu.roll(h_t, shift=(-d) % n_cols, axis=1) if d else h_t
        shifted.append(sh)
    taps2 = jnp.concatenate(shifted, axis=0) * mask2_ref[...]      # (KK2*planes, NP)

    # conv2 + bn2 bias + residual + relu: one fused-contraction matmul, lane-dense store
    out = jnp.dot(w2_ref[...], taps2, preferred_element_type=jnp.float32)
    out_ref[...] = jnp.maximum(out + bias2_ref[...] + res_t, 0.0).astype(out_ref.dtype)


def _conv2_boundary_mask(n, ho, wo, kh2, kw2, planes):
    """0/1 mask (KK2*planes, N*Ho*Wo): zero where tap (a,b) falls outside the image."""
    p = ho * wo
    npix = n * p
    m = np.zeros((kh2 * kw2, planes, npix), np.float32)
    for t in range(kh2 * kw2):
        a, b = t // kw2, t % kw2
        di, dj = a - kh2 // 2, b - kw2 // 2
        for nn in range(n):
            for i in range(ho):
                if not 0 <= i + di < ho:
                    continue
                for j in range(wo):
                    if not 0 <= j + dj < wo:
                        continue
                    m[t, :, nn * p + i * wo + j] = 1.0
    return m.reshape(kh2 * kw2 * planes, npix)


def fold_mask_bn(mask, gamma, beta, mean, var, eps=1e-5):
    """BN is applied AFTER the channel mask: bn(mask*conv) = conv*(mask*g/std) + (beta - mean*g/std)."""
    inv = gamma / jnp.sqrt(var + eps)
    return mask * inv, beta - mean * inv


def basic_block_with_dropout(x, w1, w2, w_ds, s1, b1, s2, b2, sd, bd, *, stride):
    """x: (N, Cin, H, W) NCHW. w1/w2/w_ds: PyTorch OIHW. s*/b*: folded mask*BN scale / bias."""
    N, Cin, H, W = x.shape
    planes = w1.shape[0]
    KH, KW = w1.shape[2], w1.shape[3]
    KK = KH * KW
    pad = KH // 2
    Ho = (H + 2 * pad - KH) // stride + 1
    Wo = (W + 2 * pad - KW) // stride + 1
    NP = N * Ho * Wo
    KH2, KW2 = w2.shape[2], w2.shape[3]
    KK2 = KH2 * KW2
    f32 = jnp.float32

    # ---- conv1 + downsample taps, transposed im2col (features x positions) — layout glue ----
    xp = jnp.pad(x, ((0, 0), (0, 0), (pad, pad), (pad, pad)))
    taps = []
    for a in range(KH):
        for b in range(KW):
            taps.append(xp[:, :, a:a + stride * (Ho - 1) + 1:stride,
                            b:b + stride * (Wo - 1) + 1:stride])
    t1 = jnp.stack(taps, axis=0)                                    # (KK, N, Cin, Ho, Wo)
    t1 = t1.transpose(0, 2, 1, 3, 4).reshape(KK * Cin, NP)          # rows t*Cin+c, cols n*P+i*Wo+j
    td = x[:, :, ::stride, ::stride]                                # 1x1 stride-s downsample taps
    td = td.transpose(1, 0, 2, 3).reshape(Cin, NP)
    taps_c = jnp.concatenate([t1, td], axis=0).astype(f32)          # (KK*Cin + Cin, NP)

    # ---- fold (mask * bn) scales into the weights; fuse conv1 + conv_ds output channels -----
    w1_flat = jnp.transpose(w1, (2, 3, 1, 0)).reshape(KK * Cin, planes) * s1[None, :]
    wds_mat = jnp.transpose(w_ds[:, :, 0, 0], (1, 0)) * sd[None, :]           # (Cin, planes)
    wc = jnp.zeros((KK * Cin + Cin, 2 * planes), f32)
    wc = wc.at[:KK * Cin, :planes].set(w1_flat)
    wc = wc.at[KK * Cin:, planes:].set(wds_mat)
    wc_t = wc.T.astype(f32)                                          # (2*planes, KK*Cin + Cin)
    bias_c = jnp.concatenate([b1, bd]).reshape(2 * planes, 1).astype(f32)

    w2_flat = jnp.transpose(w2, (2, 3, 1, 0)).reshape(KK2 * planes, planes) * s2[None, :]
    w2_t = w2_flat.T.astype(f32)                                     # (planes, KK2*planes)
    bias2 = b2.reshape(planes, 1).astype(f32)

    # ---- tiny constant boundary mask for conv2's rolled taps (trace-time numpy) -------------
    mask2 = jnp.asarray(_conv2_boundary_mask(N, Ho, Wo, KH2, KW2, planes), dtype=f32)

    kernel = functools.partial(_fused_basic_block_kernel,
                               planes=planes, kh2=KH2, kw2=KW2, wo=Wo, n_cols=NP)
    # Single program, everything resident in VMEM (~30 KB total); output is a lane-dense
    # (planes, N*Ho*Wo) = (8, 128) slab.
    out_t = pl.pallas_call(
        kernel,
        out_shape=jax.ShapeDtypeStruct((planes, NP), f32),
    )(taps_c, wc_t, bias_c, mask2, w2_t, bias2)

    # (planes, N*Ho*Wo) -> NCHW
    return out_t.reshape(planes, N, Ho, Wo).transpose(1, 0, 2, 3)


if __name__ == "__main__":
    key = jax.random.PRNGKey(0)
    keys = jax.random.split(key, 8)

    N, Cin, H, W = 2, 4, 16, 16          # x = [2, 4, 16, 16] NCHW, like the PyTorch module
    planes, stride = 8, 2                # BasicBlock with downsample (stride 2, channel expand)
    keep = 0.5

    x = jax.random.normal(keys[0], (N, Cin, H, W), jnp.float32)

    # conv weights, PyTorch OIHW layout, bias-free (ResNet convs)
    w1 = 0.2 * jax.random.normal(keys[1], (planes, Cin, 3, 3), jnp.float32)
    w2 = 0.2 * jax.random.normal(keys[2], (planes, planes, 3, 3), jnp.float32)
    w_ds = 0.2 * jax.random.normal(keys[3], (planes, Cin, 1, 1), jnp.float32)

    def bn_params(k):
        k1, k2, k3, k4 = jax.random.split(k, 4)
        gamma = 1.0 + 0.1 * jax.random.normal(k1, (planes,), jnp.float32)
        beta = 0.1 * jax.random.normal(k2, (planes,), jnp.float32)
        mean = 0.1 * jax.random.normal(k3, (planes,), jnp.float32)
        var = jnp.abs(jax.random.normal(k4, (planes,), jnp.float32)) + 0.5
        return gamma, beta, mean, var

    bn1 = bn_params(keys[4])
    bn2 = bn_params(keys[5])
    bn_ds = bn_params(keys[6])

    # deterministic channel-keep mask (random=False path): keep first ceil(keep*C) channels
    n_keep = math.ceil(keep * planes)
    mask = jnp.zeros((planes,), jnp.float32).at[:n_keep].set(1.0)

    s1, b1 = fold_mask_bn(mask, *bn1)
    s2, b2 = fold_mask_bn(mask, *bn2)
    sd, bd = fold_mask_bn(mask, *bn_ds)

    fwd = jax.jit(functools.partial(basic_block_with_dropout, stride=stride))
    out = fwd(x, w1, w2, w_ds, s1, b1, s2, b2, sd, bd)
    out = jax.block_until_ready(out)

    # --- pure-JAX NCHW reference check ---
    def conv_nchw(x_, w_, s_, p_):
        return jax.lax.conv_general_dilated(
            x_, w_, window_strides=(s_, s_), padding=[(p_, p_), (p_, p_)],
            dimension_numbers=("NCHW", "OIHW", "NCHW"))

    def bn_nchw(y, p):
        g, be, m, v = (t[None, :, None, None] for t in p)
        return (y - m) / jnp.sqrt(v + 1e-5) * g + be

    mask_b = mask[None, :, None, None]
    rh = jax.nn.relu(bn_nchw(conv_nchw(x, w1, stride, 1) * mask_b, bn1))
    rres = bn_nchw(conv_nchw(x, w_ds, stride, 0) * mask_b, bn_ds)
    rout = jax.nn.relu(bn_nchw(conv_nchw(rh, w2, 1, 1) * mask_b, bn2) + rres)
    np.testing.assert_allclose(np.asarray(out), np.asarray(rout), rtol=2e-3, atol=2e-3)

    print("KERNEL_OK")
</pallas_src>

<mosaic_0001>
module attributes {stable_mosaic.version = 11 : i64} {
  func.func @_fused_basic_block_kernel(%arg0: memref<40x128xf32, #tpu.memory_space<vmem>>, %arg1: memref<16x40xf32, #tpu.memory_space<vmem>>, %arg2: memref<16x1xf32, #tpu.memory_space<vmem>>, %arg3: memref<72x128xf32, #tpu.memory_space<vmem>>, %arg4: memref<8x72xf32, #tpu.memory_space<vmem>>, %arg5: memref<8x1xf32, #tpu.memory_space<vmem>>, %arg6: memref<8x128xf32, #tpu.memory_space<vmem>>) attributes {dimension_semantics = [], scalar_prefetch = 0 : i64, scratch_operands = 0 : i64, tpu.core_type = #tpu.core_type<tc>} {
    %c0 = arith.constant 0 : index
    %c0_0 = arith.constant 0 : index
    %0 = vector.load %arg1[%c0, %c0_0] : memref<16x40xf32, #tpu.memory_space<vmem>>, vector<16x40xf32>
    %c0_1 = arith.constant 0 : index
    %c0_2 = arith.constant 0 : index
    %1 = vector.load %arg0[%c0_1, %c0_2] : memref<40x128xf32, #tpu.memory_space<vmem>>, vector<40x128xf32>
    %cst = arith.constant dense<0.000000e+00> : vector<16x128xf32>
    %2 = tpu.matmul %0, %1, %cst {dimension_numbers = #tpu.dot_dimension_numbers<[1], [0], [0], [1], [0, 0, 1, 1], [], []>} : vector<16x40xf32>, vector<40x128xf32>, vector<16x128xf32> -> vector<16x128xf32>
    %c0_3 = arith.constant 0 : index
    %c0_4 = arith.constant 0 : index
    %3 = vector.load %arg2[%c0_3, %c0_4] : memref<16x1xf32, #tpu.memory_space<vmem>>, vector<16x1xf32>
    %4 = vector.broadcast %3 : vector<16x1xf32> to vector<16x128xf32>
    %5 = arith.addf %2, %4 : vector<16x128xf32>
    %6 = vector.extract_strided_slice %5 {offsets = [0, 0], sizes = [8, 128], strides = [1, 1]} : vector<16x128xf32> to vector<8x128xf32>
    %cst_5 = arith.constant 0.000000e+00 : f32
    %7 = vector.broadcast %cst_5 : f32 to vector<8x128xf32>
    %8 = arith.maximumf %6, %7 : vector<8x128xf32>
    %9 = vector.extract_strided_slice %5 {offsets = [8, 0], sizes = [8, 128], strides = [1, 1]} : vector<16x128xf32> to vector<8x128xf32>
    %c9_i32 = arith.constant 9 : i32
    %10 = tpu.dynamic_rotate %8 by %c9_i32 dim 1 : vector<8x128xf32>, i32 -> vector<8x128xf32>
    %c8_i32 = arith.constant 8 : i32
    %11 = tpu.dynamic_rotate %8 by %c8_i32 dim 1 : vector<8x128xf32>, i32 -> vector<8x128xf32>
    %c7_i32 = arith.constant 7 : i32
    %12 = tpu.dynamic_rotate %8 by %c7_i32 dim 1 : vector<8x128xf32>, i32 -> vector<8x128xf32>
    %c1_i32 = arith.constant 1 : i32
    %13 = tpu.dynamic_rotate %8 by %c1_i32 dim 1 : vector<8x128xf32>, i32 -> vector<8x128xf32>
    %c127_i32 = arith.constant 127 : i32
    %14 = tpu.dynamic_rotate %8 by %c127_i32 dim 1 : vector<8x128xf32>, i32 -> vector<8x128xf32>
    %c121_i32 = arith.constant 121 : i32
    %15 = tpu.dynamic_rotate %8 by %c121_i32 dim 1 : vector<8x128xf32>, i32 -> vector<8x128xf32>
    %c120_i32 = arith.constant 120 : i32
    %16 = tpu.dynamic_rotate %8 by %c120_i32 dim 1 : vector<8x128xf32>, i32 -> vector<8x128xf32>
    %c119_i32 = arith.constant 119 : i32
    %17 = tpu.dynamic_rotate %8 by %c119_i32 dim 1 : vector<8x128xf32>, i32 -> vector<8x128xf32>
    %18 = tpu.concatenate %10, %11, %12, %13, %8, %14, %15, %16, %17 in 0 : vector<8x128xf32>, vector<8x128xf32>, vector<8x128xf32>, vector<8x128xf32>, vector<8x128xf32>, vector<8x128xf32>, vector<8x128xf32>, vector<8x128xf32>, vector<8x128xf32> -> vector<72x128xf32>
    %c0_6 = arith.constant 0 : index
    %c0_7 = arith.constant 0 : index
    %19 = vector.load %arg3[%c0_6, %c0_7] : memref<72x128xf32, #tpu.memory_space<vmem>>, vector<72x128xf32>
    %20 = arith.mulf %18, %19 : vector<72x128xf32>
    %c0_8 = arith.constant 0 : index
    %c0_9 = arith.constant 0 : index
    %21 = vector.load %arg4[%c0_8, %c0_9] : memref<8x72xf32, #tpu.memory_space<vmem>>, vector<8x72xf32>
    %cst_10 = arith.constant dense<0.000000e+00> : vector<8x128xf32>
    %22 = tpu.matmul %21, %20, %cst_10 {dimension_numbers = #tpu.dot_dimension_numbers<[1], [0], [0], [1], [0, 0, 1, 1], [], []>} : vector<8x72xf32>, vector<72x128xf32>, vector<8x128xf32> -> vector<8x128xf32>
    %c0_11 = arith.constant 0 : index
    %c0_12 = arith.constant 0 : index
    %23 = vector.load %arg5[%c0_11, %c0_12] : memref<8x1xf32, #tpu.memory_space<vmem>>, vector<8x1xf32>
    %24 = vector.broadcast %23 : vector<8x1xf32> to vector<8x128xf32>
    %25 = arith.addf %22, %24 : vector<8x128xf32>
    %26 = arith.addf %25, %9 : vector<8x128xf32>
    %cst_13 = arith.constant 0.000000e+00 : f32
    %27 = vector.broadcast %cst_13 : f32 to vector<8x128xf32>
    %28 = arith.maximumf %26, %27 : vector<8x128xf32>
    %c0_14 = arith.constant 0 : index
    %c0_15 = arith.constant 0 : index
    %29 = vector.load %arg6[%c0_14, %c0_15] : memref<8x128xf32, #tpu.memory_space<vmem>>, vector<8x128xf32>
    tpu.vector_store %arg6[%c0_14, %c0_15], %28 {strides = array<i32>} : memref<8x128xf32, #tpu.memory_space<vmem>>, vector<8x128xf32>,
    return
  }
}

</mosaic_0001>

<bundles_post_ra>
// kernel: basic_block_with_dropout.1
= control target key start
LH: loop header
LB: loop body
LE: loop exit
PB: predicated region body
PF: predicated region fallthrough
CT: control target
= control target key end

     0   :  { %vm42_vm0 = vcmask 326656   ;;  %v314_v2 = vmov 0   ;;  %v315_v9 = vmov 0.0   ;;  %s317_s13 = smov 119   ;;  %s318_s14 = smov 121   ;;  %vm320_vm1 = vmmov 0   ;;  %s438_s0 = inlined_call_operand.vmem [shape: f32[40,128], index: 0, kind: input, shape index: {}]   ;;  %s439_s1 = inlined_call_operand.vmem [shape: f32[16,40], index: 1, kind: input, shape index: {}]   ;;  %s440_s2 = inlined_call_operand.vmem [shape: f32[16,1], index: 2, kind: input, shape index: {}]   ;;  %s441_s5 = inlined_call_operand.vmem [shape: f32[8,1], index: 5, kind: input, shape index: {}]   ;;  %s442_s3 = inlined_call_operand.vmem [shape: f32[72,128], index: 3, kind: input, shape index: {}]   ;;  %s443_s4 = inlined_call_operand.vmem [shape: f32[8,72], index: 4, kind: input, shape index: {}]   ;;  %s444_s6 = inlined_call_operand.vmem [shape: f32[8,128], index: 6, kind: output, shape index: {}]  }
   0x1   :  { %v29_v0 = vld [vmem:[%s438_s0 + $0x20] sm:$0xff]  ;;  %v28_v1 = vld [vmem:[%s438_s0 + $0x18] sm:$0xff]  ;;  %312 = vset.pattern.permute.xlu0 %v314_v2  ;;  %313 = vset.pattern.permute.xlu1 %v314_v2  ;;  %v27_v4 = vld [vmem:[%s438_s0 + $0x10] sm:$0xff]  ;;  %s321_s15 = smov 1   ;;  %s322_s16 = smov 7   ;;  %vm166_vm2 = vcmask 588800  }
   0x2   :  { %267 = vmatprep.subr.mxu0 %v29_v0  ;;  %v23_v3 = vld [vmem:[%s439_s1] sm:$0xff]  ;;  %v26_v6 = vld [vmem:[%s438_s0 + $0x8] sm:$0xff]  ;;  %280 = vmatprep.subr.mxu1 %v315_v9  ;;  %s323_s17 = smov 8   ;;  %s324_s18 = smov 9   ;;  %v148_v18 = vld [vmem:[%s442_s3 + $0x38] sm:$0xff] }
   0x3   :  { %268 = vmatpush3.msra.mxu0 %v29_v0  ;;  %277 = vmatprep.mubr.msk.f32.mxu0 %vm42_vm0, %v23_v3  ;;  %v30_v5 = vld [vmem:[%s440_s2] sm:$0xff]  ;;  %v24_v8 = vld [vmem:[%s439_s1 + $0x8] sm:$0xff]  ;;  %s319_s1 = smov 127   ;;  %v147_v22 = vld [vmem:[%s442_s3 + $0x30] sm:$0xff] }
   0x4   :  { %269 = vmatprep.subr.mxu0 %v28_v1  ;;  %34 = vperm.xlu0 %312, %v30_v5   ;;  %v25_v7 = vld [vmem:[%s438_s0] sm:$0xff]  ;;  %s316_s0 = smov 120   ;;  %v31_v15 = vld [vmem:[%s440_s2 + $0x8] sm:$0xff]  ;;  %v144_v30 = vld [vmem:[%s442_s3 + $0x18] sm:$0xff] }
   0x5   :  { %270 = vmatpush3.msra.mxu0 %v28_v1  ;;  %298 = vmatprep.mubr.msk.f32.mxu1 %vm320_vm1, %v315_v9  ;;  %v160_v16 = vld [vmem:[%s441_s5] sm:$0xff]  ;;  %v146_v25 = vld [vmem:[%s442_s3 + $0x28] sm:$0xff]  ;;  %v143_v34 = vld [vmem:[%s442_s3 + $0x10] sm:$0xff] }
   0x6   :  { %271 = vmatprep.subr.mxu0 %v27_v4  ;;  %v149_v17 = vld [vmem:[%s442_s3 + $0x40] sm:$0xff]  ;;  %v142_v36 = vld [vmem:[%s442_s3 + $0x8] sm:$0xff] }
   0x7   :  { %272 = vmatpush3.msra.mxu0 %v27_v4  ;;  %v145_v28 = vld [vmem:[%s442_s3 + $0x20] sm:$0xff] }
   0x8   :  { %273 = vmatprep.subr.mxu0 %v26_v6  ;;  %v141_v39 = vld [vmem:[%s442_s3] sm:$0xff] }
   0x9   :  { %274 = vmatpush3.msra.mxu0 %v26_v6  ;;  %v159_v43 = vld [vmem:[%s443_s4] sm:$0xff] }
   0xa   :  { %275 = vmatprep.subr.mxu0 %v25_v7 }
   0xb   :  { %276 = vmatpush3.msra.mxu0 %v25_v7 }
   0xc   :  { %278 = vmatmul.mubr.msk.f32.vlgmr.msra.gmra.mxu0 %vm42_vm0, %v24_v8 }
  0x7f   :  { %v35_v11 = vpop.permute.xlu0 %34 }
  0xcc   :  { %v387_v10 = vpop.f32.mrf.mxu0 }
  0xce   :  { %v115_v12 = vpop.f32.mrf.mxu0 }
  0xcf   :  { %v116_v13 = vadd.f32 %v115_v12, %v35_v11 }
  0xd1   :  { %v124_v14 = vmax.f32 %v116_v13, 0.0 }
  0xd3   :  { %137 = vrot.lane.b32.xlu1 %v124_v14, %s316_s0  ;;  %139 = vrot.lane.b32.xlu0 %v124_v14, %s317_s13  ;;  %v154_v33 = vmul.f32 %v145_v28, %v124_v14 }
  0xd7   :  { %135 = vrot.lane.b32.xlu1 %v124_v14, %s318_s14  ;;  %133 = vrot.lane.b32.xlu0 %v124_v14, %s319_s1 }
  0xdb   :  { %131 = vrot.lane.b32.xlu1 %v124_v14, %s321_s15  ;;  %129 = vrot.lane.b32.xlu0 %v124_v14, %s322_s16 }
  0xdf   :  { %127 = vrot.lane.b32.xlu1 %v124_v14, %s323_s17  ;;  %125 = vrot.lane.b32.xlu0 %v124_v14, %s324_s18 }
  0xe3   :  { %39 = vperm.xlu1 %313, %v31_v15   ;;  %163 = vperm.xlu0 %312, %v160_v16  }
 0x145   :  { %v138_v19 = vpop.permute.xlu1 %137  ;;  %v140_v20 = vpop.permute.xlu0 %139 }
 0x146   :  { %v158_v21 = vmul.f32 %v149_v17, %v140_v20  ;;  %v157_v23 = vmul.f32 %v148_v18, %v138_v19 }
 0x148   :  { %281 = vmatpush3.msra.mxu1 %v158_v21 }
 0x149   :  { %v136_v24 = vpop.permute.xlu1 %135  ;;  %282 = vmatprep.subr.mxu1 %v315_v9  ;;  %v134_v26 = vpop.permute.xlu0 %133 }
 0x14a   :  { %v156_v27 = vmul.f32 %v147_v22, %v136_v24  ;;  %283 = vmatpush3.msra.mxu1 %v157_v23  ;;  %v155_v29 = vmul.f32 %v146_v25, %v134_v26 }
 0x14b   :  { %284 = vmatprep.subr.mxu1 %v315_v9 }
 0x14c   :  { %285 = vmatpush3.msra.mxu1 %v156_v27 }
 0x14d   :  { %v132_v31 = vpop.permute.xlu1 %131  ;;  %286 = vmatprep.subr.mxu1 %v315_v9  ;;  %v130_v32 = vpop.permute.xlu0 %129 }
 0x14e   :  { %287 = vmatpush3.msra.mxu1 %v155_v29  ;;  %v153_v35 = vmul.f32 %v144_v30, %v132_v31  ;;  %v152_v38 = vmul.f32 %v143_v34, %v130_v32 }
 0x14f   :  { %288 = vmatprep.subr.mxu1 %v315_v9 }
 0x150   :  { %289 = vmatpush3.msra.mxu1 %v154_v33 }
 0x151   :  { %v128_v37 = vpop.permute.xlu1 %127  ;;  %290 = vmatprep.subr.mxu1 %v315_v9  ;;  %v126_v40 = vpop.permute.xlu0 %125 }
 0x152   :  { %291 = vmatpush3.msra.mxu1 %v153_v35  ;;  %v151_v41 = vmul.f32 %v142_v36, %v128_v37  ;;  %v150_v42 = vmul.f32 %v141_v39, %v126_v40 }
 0x153   :  { %292 = vmatprep.subr.mxu1 %v315_v9 }
 0x154   :  { %293 = vmatpush3.msra.mxu1 %v152_v38 }
 0x155   :  { %294 = vmatprep.subr.mxu1 %v315_v9 }
 0x156   :  { %295 = vmatpush3.msra.mxu1 %v151_v41 }
 0x157   :  { %296 = vmatprep.subr.mxu1 %v315_v9 }
 0x158   :  { %297 = vmatpush3.msra.mxu1 %v150_v42 }
 0x159   :  { %299 = vmatmul.mubr.msk.f32.vlgmr.msra.gmra.mxu1 %vm166_vm2, %v159_v43 }
 0x15e   :  { %v40_v44 = vpop.permute.xlu1 %39  ;;  %v164_v45 = vpop.permute.xlu0 %163 }
 0x15f   :  { %v121_v47 = vadd.f32 %v387_v10, %v40_v44 }
 0x219   :  { %v236_v46 = vpop.f32.mrf.mxu1 }
 0x21a   :  { %v237_v48 = vadd.f32 %v236_v46, %v164_v45 }
 0x21b   :  { %v300_v49 = vpop.f32.mrf.mxu1 }
 0x21c   :  { %v240_v50 = vadd.f32 %v237_v48, %v121_v47 }
 0x21e   :  { %v241_v51 = vmax.f32 %v240_v50, 0.0 }
 0x220   :  { %242 = vst [vmem:[%s444_s6] sm:$0xff] %v241_v51 }

</bundles_post_ra>
